<compile_context>
chip_gen: v5e
topology: v5e:2x2
jax: 0.10.0
libtpu: 0.0.40
codegen_flags: <defaults>
</compile_context>

<pallas_src>
import functools

import jax
import jax.numpy as jnp
from jax.experimental import pallas as pl
from jax.experimental.pallas import tpu as pltpu


_LANES = 128


def _round_up(x, m):
    return (x + m - 1) // m * m


@functools.lru_cache(maxsize=None)
def _tpu_config():
    """Returns (num_splits, step_bytes, vmem_limit_bytes) for the local TPU."""
    kind = ""
    try:
        kind = jax.devices()[0].device_kind.lower()
    except Exception:
        pass
    vmem_cap = 128 * 1024 * 1024
    try:
        info = pltpu.get_tpu_info()
        vmem_cap = int(getattr(info, "vmem_capacity_bytes", vmem_cap))
    except Exception:
        pass
    is_v7 = ("v7" in kind) or (vmem_cap <= 64 * 1024 * 1024)
    if is_v7:
        # 2 TensorCores / chip, 64 MiB VMEM per TC: keep headroom.
        num_splits, step_bytes, vmem_limit = 2, 8 << 20, 44 << 20
    else:
        # v5e / v6e: single TC, 128 MiB physical VMEM.
        num_splits, step_bytes, vmem_limit = 1, 12 << 20, 56 << 20
    # Defensive caps for older / smaller-VMEM parts.
    vmem_limit = min(vmem_limit, max(8 << 20, (vmem_cap * 3) // 4))
    step_bytes = min(step_bytes, max(1 << 20, vmem_limit // 3))
    return num_splits, step_bytes, vmem_limit


def _jaccard_partial_kernel(yp_ref, yt_ref, acc_ref, *, hw, ts, rg, t_inner,
                            need_mask):
    """Accumulate per-batch partial sums for the Jaccard loss.

    yp_ref : (N, 2, Ts, 128)  predictions, native dtype
    yt_ref : (N, 1, Ts, 128)  labels, native dtype
    acc_ref: (5, N, 8, 128)   f32 resident accumulator for this parallel split
             rows: [sum(fg), sum(p0), sum(p1), sum(fg*p0), sum(fg*p1)]
    Boundary / duplicate blocks are handled by masking against the true pixel
    count `hw` (in-bounds pixels only), so no HBM padding is required.
    """
    t = pl.program_id(1)

    @pl.when(t == 0)
    def _init():
        acc_ref[...] = jnp.zeros_like(acc_ref)

    n = yp_ref.shape[0]
    n_groups = ts // rg
    blk = pl.program_id(0) * t_inner + t          # unclamped logical block id
    base_pix = blk * (ts * _LANES)                # first flat pixel of block

    if need_mask:
        sub = jax.lax.broadcasted_iota(jnp.int32, (1, rg, _LANES), 1)
        lane = jax.lax.broadcasted_iota(jnp.int32, (1, rg, _LANES), 2)
        off = sub * _LANES + lane                 # slab-local flat offsets

    def body(g, carry):
        a_fg, a_p0, a_p1, a_i0, a_i1 = carry
        r0 = pl.multiple_of(g * rg, rg)
        yt = yt_ref[:, 0, pl.ds(r0, rg), :]                        # (N, rg, 128)
        yp0 = yp_ref[:, 0, pl.ds(r0, rg), :].astype(jnp.float32)
        yp1 = yp_ref[:, 1, pl.ds(r0, rg), :].astype(jnp.float32)

        fg_m = yt > 0                        # foreground indicator
        va_m = yt >= 0                       # ignore-mask (applied to preds)
        if need_mask:
            pix = base_pix + r0 * _LANES + off
            inb = pix < hw
            fg_m = jnp.logical_and(inb, fg_m)
            va_m = jnp.logical_and(inb, va_m)

        # jnp.where (not multiply) so garbage in OOB rows can never poison sums.
        fg = jnp.where(fg_m, 1.0, 0.0).astype(jnp.float32)
        p0 = jnp.where(va_m, yp0, 0.0)
        p1 = jnp.where(va_m, yp1, 0.0)
        return (a_fg + fg, a_p0 + p0, a_p1 + p1, a_i0 + fg * p0, a_i1 + fg * p1)

    z = jnp.zeros((n, rg, _LANES), jnp.float32)
    unroll = 4 if n_groups % 4 == 0 else (2 if n_groups % 2 == 0 else 1)
    a_fg, a_p0, a_p1, a_i0, a_i1 = jax.lax.fori_loop(
        0, n_groups, body, (z, z, z, z, z), unroll=unroll)

    def fold8(x):
        # (N, rg, 128) -> (N, 8, 128) with pure VPU adds (no cross-lane reduce).
        if rg == 8:
            return x
        return x.reshape(n, rg // 8, 8, _LANES).sum(axis=1)

    acc_ref[0] += fold8(a_fg)
    acc_ref[1] += fold8(a_p0)
    acc_ref[2] += fold8(a_p1)
    acc_ref[3] += fold8(a_i0)
    acc_ref[4] += fold8(a_i1)


@functools.partial(jax.jit, static_argnames=("eps",))
def jaccard_loss(y_pred, y_true, eps=1e-6):
    """Pallas implementation of JaccardLoss.forward.

    y_pred: (N, 2, H, W)  (any float dtype)
    y_true: (N, 1, H, W)  (negative values = ignore, >0 = foreground)
    returns scalar float32 loss
    """
    N, C, H, W = y_pred.shape
    assert C == 2, "JaccardLoss uses num_classes=2"
    assert y_true.shape == (N, 1, H, W)
    HW = H * W

    num_splits, step_bytes, vmem_limit = _tpu_config()

    itemsize_p = jnp.dtype(y_pred.dtype).itemsize
    itemsize_t = jnp.dtype(y_true.dtype).itemsize
    # dtype-dependent sublane packing multiple: f32 -> 8, bf16 -> 16, int8 -> 32
    sub_mult = max(8, 32 // itemsize_p, 32 // itemsize_t)

    # --- layout: flatten spatial dims; pad only the sub-128 lane remainder ---
    HW_128 = _round_up(HW, _LANES)
    s_rows = HW_128 // _LANES
    yp = y_pred.reshape(N, C, HW)
    yt = y_true.reshape(N, 1, HW)
    if HW_128 != HW:
        pad = HW_128 - HW
        # Pad value is irrelevant: the kernel masks pixels with index >= HW.
        yp = jnp.pad(yp, ((0, 0), (0, 0), (0, pad)))
        yt = jnp.pad(yt, ((0, 0), (0, 0), (0, pad)))
    yp = yp.reshape(N, C, s_rows, _LANES)
    yt = yt.reshape(N, 1, s_rows, _LANES)

    # --- tile sizing: (Ts, 128)-dense blocks within the per-step byte budget ---
    bytes_per_row = _LANES * N * (C * itemsize_p + itemsize_t)
    ts_budget = max(sub_mult, (step_bytes // bytes_per_row) // sub_mult * sub_mult)
    rows_per_split = -(-s_rows // num_splits)
    # Aim for >= 2 steps per split so input double-buffering has work to hide.
    ts = min(ts_budget, _round_up(-(-rows_per_split // 2), sub_mult))
    ts = max(ts, sub_mult)
    t_inner = -(-rows_per_split // ts)
    last_block = -(-s_rows // ts) - 1
    # If the grid covers exactly HW pixels, the in-kernel mask is not needed.
    need_mask = (num_splits * t_inner * ts * _LANES) != HW

    def in_idx(p, t):
        # Clamp so a (fully masked) duplicate block is read instead of an
        # entirely out-of-bounds one.
        blk = jnp.minimum(p * t_inner + t, last_block)
        return (0, 0, blk, 0)

    kernel = functools.partial(
        _jaccard_partial_kernel,
        hw=HW, ts=ts, rg=sub_mult, t_inner=t_inner, need_mask=need_mask)

    partials = pl.pallas_call(
        kernel,
        out_shape=jax.ShapeDtypeStruct((num_splits, 5, N, 8, _LANES), jnp.float32),
        grid=(num_splits, t_inner),
        in_specs=[
            pl.BlockSpec((N, C, ts, _LANES), in_idx),
            pl.BlockSpec((N, 1, ts, _LANES), in_idx),
        ],
        out_specs=pl.BlockSpec(
            (None, 5, N, 8, _LANES), lambda p, t: (p, 0, 0, 0, 0)
        ),
        compiler_params=pltpu.CompilerParams(
            dimension_semantics=("parallel", "arbitrary"),
            vmem_limit_bytes=vmem_limit,
        ),
    )(yp, yt)

    # --- tiny epilogue in plain XLA: cross-lane reduce + jaccard math ---
    totals = jnp.sum(partials, axis=(0, 3, 4))          # (5, N)
    fg_sum = totals[0]
    p0_sum = totals[1]
    p1_sum = totals[2]
    fgp0 = totals[3]
    fgp1 = totals[4]

    hw = jnp.float32(HW)
    # Background one-hot count includes ignore pixels (matches reference).
    inter = jnp.stack([p0_sum - fgp0, fgp1], axis=1)                      # (N, 2)
    usum = jnp.stack([(hw - fg_sum) + p0_sum, fg_sum + p1_sum], axis=1)   # (N, 2)
    union = usum - inter
    jaccard = 1.0 - (inter + eps) / (union + eps)
    return jnp.mean(jaccard)


def jaccard_loss_ref(y_pred, y_true, eps=1e-6):
    """Pure-JAX reference mirroring the PyTorch forward exactly."""
    y_pred = y_pred.astype(jnp.float32)
    y_true = y_true.astype(jnp.float32)
    mask = (y_true >= 0).astype(jnp.float32)                     # (N,1,H,W)
    fg = (y_true[:, 0] > 0).astype(jnp.float32)                  # (N,H,W)
    gt_one_hot = jnp.stack([1.0 - fg, fg], axis=1)               # (N,2,H,W)
    yp = y_pred * mask
    intersection = jnp.sum(gt_one_hot * yp, axis=(2, 3))
    union = jnp.sum(gt_one_hot + yp, axis=(2, 3)) - intersection
    jaccard = 1.0 - (intersection + eps) / (union + eps)
    return jnp.mean(jaccard)


if __name__ == "__main__":
    key = jax.random.PRNGKey(0)
    k1, k2, k3, k4 = jax.random.split(key, 4)

    # Test 1: float32, 16x16 spatial (labels in {-1 ignore, 0 bg, 1 fg});
    # 128-aligned HW -> no HBM pad, boundary-row masking exercised.
    N, C, H, W = 2, 2, 16, 16
    y_pred = jax.random.uniform(k1, (N, C, H, W), dtype=jnp.float32)
    y_true = jax.random.randint(k2, (N, 1, H, W), minval=-1, maxval=2).astype(
        jnp.float32
    )
    loss = jax.block_until_ready(jaccard_loss(y_pred, y_true))
    ref = jax.block_until_ready(jaccard_loss_ref(y_pred, y_true))
    assert jnp.allclose(loss, ref, rtol=1e-4, atol=1e-5), (loss, ref)

    # Test 2: bf16 predictions + odd spatial size (exercises in-kernel cast,
    # the 16-sublane packing multiple, and the sub-128 lane remainder mask).
    N2, H2, W2 = 2, 13, 10
    y_pred2 = jax.random.uniform(k3, (N2, 2, H2, W2), dtype=jnp.float32).astype(
        jnp.bfloat16
    )
    y_true2 = jax.random.randint(k4, (N2, 1, H2, W2), minval=-1, maxval=2).astype(
        jnp.float32
    )
    loss2 = jax.block_until_ready(jaccard_loss(y_pred2, y_true2))
    ref2 = jax.block_until_ready(jaccard_loss_ref(y_pred2, y_true2))
    assert jnp.allclose(loss2, ref2, rtol=1e-4, atol=1e-4), (loss2, ref2)

    print("KERNEL_OK")
</pallas_src>

<mosaic_0001>
module attributes {stable_mosaic.version = 11 : i64} {
  func.func @_jaccard_partial_kernel(%arg0: i32, %arg1: i32, %arg2: memref<2x2x8x128xf32, #tpu.memory_space<vmem>>, %arg3: memref<2x1x8x128xf32, #tpu.memory_space<vmem>>, %arg4: memref<1x5x2x8x128xf32, #tpu.memory_space<vmem>>) attributes {dimension_semantics = [#tpu.dimension_semantics<parallel>, #tpu.dimension_semantics<arbitrary>], iteration_bounds = array<i64: 1, 1>, scalar_prefetch = 0 : i64, scratch_operands = 0 : i64, tpu.core_type = #tpu.core_type<tc>, window_params = [{transform_indices = @transform_0, window_bounds = array<i64: 2, 2, 8, 128>}, {transform_indices = @transform_1, window_bounds = array<i64: 2, 1, 8, 128>}, {transform_indices = @transform_2, window_bounds = array<i64: 1, 5, 2, 8, 128>}]} {
    %c0_i32 = arith.constant 0 : i32
    %0 = arith.cmpi eq, %arg1, %c0_i32 : i32
    %1 = arith.extui %0 : i1 to i32
    %c0_i32_0 = arith.constant 0 : i32
    %2 = arith.cmpi ne, %1, %c0_i32_0 : i32
    scf.if %2 {
      %cst_64 = arith.constant 0.000000e+00 : f32
      %81 = vector.broadcast %cst_64 : f32 to vector<5x2x8x128xf32>
      %c0_65 = arith.constant 0 : index
      %c0_66 = arith.constant 0 : index
      %c0_67 = arith.constant 0 : index
      %c0_68 = arith.constant 0 : index
      %c0_69 = arith.constant 0 : index
      %82 = vector.load %arg4[%c0_65, %c0_66, %c0_67, %c0_68, %c0_69] : memref<1x5x2x8x128xf32, #tpu.memory_space<vmem>>, vector<1x5x2x8x128xf32>
      %83 = vector.shape_cast %82 : vector<1x5x2x8x128xf32> to vector<5x2x8x128xf32>
      %84 = vector.shape_cast %81 : vector<5x2x8x128xf32> to vector<1x5x2x8x128xf32>
      tpu.vector_store %arg4[%c0_65, %c0_66, %c0_67, %c0_68, %c0_69], %84 {strides = array<i32>} : memref<1x5x2x8x128xf32, #tpu.memory_space<vmem>>, vector<1x5x2x8x128xf32>,
    } else {
    }
    %c1_i32 = arith.constant 1 : i32
    %3 = arith.muli %arg0, %c1_i32 : i32
    %4 = arith.addi %3, %arg1 : i32
    %c1024_i32 = arith.constant 1024 : i32
    %5 = arith.muli %4, %c1024_i32 : i32
    %6 = tpu.iota {dimensions = array<i32: 1>} : vector<1x8x128xi32>
    %7 = tpu.iota {dimensions = array<i32: 2>} : vector<1x8x128xi32>
    %c128_i32 = arith.constant 128 : i32
    %8 = vector.broadcast %c128_i32 : i32 to vector<1x8x128xi32>
    %9 = arith.muli %6, %8 : vector<1x8x128xi32>
    %10 = arith.addi %9, %7 : vector<1x8x128xi32>
    %cst = arith.constant 0.000000e+00 : f32
    %11 = vector.broadcast %cst : f32 to vector<2x8x128xf32>
    %c0_i32_1 = arith.constant 0 : i32
    %c8_i32 = arith.constant 8 : i32
    %12 = arith.muli %c0_i32_1, %c8_i32 : i32
    %13 = tpu.assume_multiple %12, 8 : i32
    %c0 = arith.constant 0 : index
    %c0_2 = arith.constant 0 : index
    %14 = arith.index_cast %13 : i32 to index
    %c0_3 = arith.constant 0 : index
    %15 = vector.load %arg3[%c0, %c0_2, %14, %c0_3] : memref<2x1x8x128xf32, #tpu.memory_space<vmem>>, vector<2x1x8x128xf32>
    %16 = vector.shape_cast %15 : vector<2x1x8x128xf32> to vector<2x8x128xf32>
    %c0_4 = arith.constant 0 : index
    %c0_5 = arith.constant 0 : index
    %17 = arith.index_cast %13 : i32 to index
    %c0_6 = arith.constant 0 : index
    %18 = vector.load %arg2[%c0_4, %c0_5, %17, %c0_6] : memref<2x2x8x128xf32, #tpu.memory_space<vmem>>, vector<2x1x8x128xf32>
    %19 = vector.shape_cast %18 : vector<2x1x8x128xf32> to vector<2x8x128xf32>
    %c0_7 = arith.constant 0 : index
    %c1 = arith.constant 1 : index
    %20 = arith.index_cast %13 : i32 to index
    %c0_8 = arith.constant 0 : index
    %21 = vector.load %arg2[%c0_7, %c1, %20, %c0_8] : memref<2x2x8x128xf32, #tpu.memory_space<vmem>>, vector<2x1x8x128xf32>
    %22 = vector.shape_cast %21 : vector<2x1x8x128xf32> to vector<2x8x128xf32>
    %cst_9 = arith.constant 0.000000e+00 : f32
    %23 = vector.broadcast %cst_9 : f32 to vector<2x8x128xf32>
    %24 = arith.cmpf ogt, %16, %23 : vector<2x8x128xf32>
    %cst_10 = arith.constant 0.000000e+00 : f32
    %25 = vector.broadcast %cst_10 : f32 to vector<2x8x128xf32>
    %26 = arith.cmpf oge, %16, %25 : vector<2x8x128xf32>
    %c128_i32_11 = arith.constant 128 : i32
    %27 = arith.muli %13, %c128_i32_11 : i32
    %28 = arith.addi %5, %27 : i32
    %29 = vector.broadcast %28 : i32 to vector<1x8x128xi32>
    %30 = arith.addi %29, %10 : vector<1x8x128xi32>
    %c256_i32 = arith.constant 256 : i32
    %31 = vector.broadcast %c256_i32 : i32 to vector<1x8x128xi32>
    %32 = arith.cmpi slt, %30, %31 : vector<1x8x128xi32>
    %33 = vector.broadcast %32 : vector<1x8x128xi1> to vector<2x8x128xi1>
    %34 = arith.andi %33, %24 : vector<2x8x128xi1>
    %35 = vector.broadcast %32 : vector<1x8x128xi1> to vector<2x8x128xi1>
    %36 = arith.andi %35, %26 : vector<2x8x128xi1>
    %cst_12 = arith.constant 1.000000e+00 : f32
    %cst_13 = arith.constant 0.000000e+00 : f32
    %37 = vector.broadcast %cst_12 : f32 to vector<2x8x128xf32>
    %38 = vector.broadcast %cst_13 : f32 to vector<2x8x128xf32>
    %39 = arith.select %34, %37, %38 : vector<2x8x128xi1>, vector<2x8x128xf32>
    %cst_14 = arith.constant 0.000000e+00 : f32
    %40 = vector.broadcast %cst_14 : f32 to vector<2x8x128xf32>
    %41 = arith.select %36, %19, %40 : vector<2x8x128xi1>, vector<2x8x128xf32>
    %cst_15 = arith.constant 0.000000e+00 : f32
    %42 = vector.broadcast %cst_15 : f32 to vector<2x8x128xf32>
    %43 = arith.select %36, %22, %42 : vector<2x8x128xi1>, vector<2x8x128xf32>
    %44 = arith.addf %11, %39 : vector<2x8x128xf32>
    %45 = arith.addf %11, %41 : vector<2x8x128xf32>
    %46 = arith.addf %11, %43 : vector<2x8x128xf32>
    %47 = arith.mulf %39, %41 : vector<2x8x128xf32>
    %48 = arith.addf %11, %47 : vector<2x8x128xf32>
    %49 = arith.mulf %39, %43 : vector<2x8x128xf32>
    %50 = arith.addf %11, %49 : vector<2x8x128xf32>
    %c1_i32_16 = arith.constant 1 : i32
    %c0_17 = arith.constant 0 : index
    %c0_18 = arith.constant 0 : index
    %c0_19 = arith.constant 0 : index
    %c0_20 = arith.constant 0 : index
    %c0_21 = arith.constant 0 : index
    %51 = vector.load %arg4[%c0_17, %c0_18, %c0_19, %c0_20, %c0_21] : memref<1x5x2x8x128xf32, #tpu.memory_space<vmem>>, vector<1x1x2x8x128xf32>
    %52 = vector.shape_cast %51 : vector<1x1x2x8x128xf32> to vector<2x8x128xf32>
    %53 = arith.addf %52, %44 : vector<2x8x128xf32>
    %c0_22 = arith.constant 0 : index
    %c0_23 = arith.constant 0 : index
    %c0_24 = arith.constant 0 : index
    %c0_25 = arith.constant 0 : index
    %c0_26 = arith.constant 0 : index
    %54 = vector.load %arg4[%c0_22, %c0_23, %c0_24, %c0_25, %c0_26] : memref<1x5x2x8x128xf32, #tpu.memory_space<vmem>>, vector<1x1x2x8x128xf32>
    %55 = vector.shape_cast %54 : vector<1x1x2x8x128xf32> to vector<2x8x128xf32>
    %56 = vector.shape_cast %53 : vector<2x8x128xf32> to vector<1x1x2x8x128xf32>
    tpu.vector_store %arg4[%c0_22, %c0_23, %c0_24, %c0_25, %c0_26], %56 {strides = array<i32>} : memref<1x5x2x8x128xf32, #tpu.memory_space<vmem>>, vector<1x1x2x8x128xf32>,
    %c0_27 = arith.constant 0 : index
    %c1_28 = arith.constant 1 : index
    %c0_29 = arith.constant 0 : index
    %c0_30 = arith.constant 0 : index
    %c0_31 = arith.constant 0 : index
    %57 = vector.load %arg4[%c0_27, %c1_28, %c0_29, %c0_30, %c0_31] : memref<1x5x2x8x128xf32, #tpu.memory_space<vmem>>, vector<1x1x2x8x128xf32>
    %58 = vector.shape_cast %57 : vector<1x1x2x8x128xf32> to vector<2x8x128xf32>
    %59 = arith.addf %58, %45 : vector<2x8x128xf32>
    %c0_32 = arith.constant 0 : index
    %c1_33 = arith.constant 1 : index
    %c0_34 = arith.constant 0 : index
    %c0_35 = arith.constant 0 : index
    %c0_36 = arith.constant 0 : index
    %60 = vector.load %arg4[%c0_32, %c1_33, %c0_34, %c0_35, %c0_36] : memref<1x5x2x8x128xf32, #tpu.memory_space<vmem>>, vector<1x1x2x8x128xf32>
    %61 = vector.shape_cast %60 : vector<1x1x2x8x128xf32> to vector<2x8x128xf32>
    %62 = vector.shape_cast %59 : vector<2x8x128xf32> to vector<1x1x2x8x128xf32>
    tpu.vector_store %arg4[%c0_32, %c1_33, %c0_34, %c0_35, %c0_36], %62 {strides = array<i32>} : memref<1x5x2x8x128xf32, #tpu.memory_space<vmem>>, vector<1x1x2x8x128xf32>,
    %c0_37 = arith.constant 0 : index
    %c2 = arith.constant 2 : index
    %c0_38 = arith.constant 0 : index
    %c0_39 = arith.constant 0 : index
    %c0_40 = arith.constant 0 : index
    %63 = vector.load %arg4[%c0_37, %c2, %c0_38, %c0_39, %c0_40] : memref<1x5x2x8x128xf32, #tpu.memory_space<vmem>>, vector<1x1x2x8x128xf32>
    %64 = vector.shape_cast %63 : vector<1x1x2x8x128xf32> to vector<2x8x128xf32>
    %65 = arith.addf %64, %46 : vector<2x8x128xf32>
    %c0_41 = arith.constant 0 : index
    %c2_42 = arith.constant 2 : index
    %c0_43 = arith.constant 0 : index
    %c0_44 = arith.constant 0 : index
    %c0_45 = arith.constant 0 : index
    %66 = vector.load %arg4[%c0_41, %c2_42, %c0_43, %c0_44, %c0_45] : memref<1x5x2x8x128xf32, #tpu.memory_space<vmem>>, vector<1x1x2x8x128xf32>
    %67 = vector.shape_cast %66 : vector<1x1x2x8x128xf32> to vector<2x8x128xf32>
    %68 = vector.shape_cast %65 : vector<2x8x128xf32> to vector<1x1x2x8x128xf32>
    tpu.vector_store %arg4[%c0_41, %c2_42, %c0_43, %c0_44, %c0_45], %68 {strides = array<i32>} : memref<1x5x2x8x128xf32, #tpu.memory_space<vmem>>, vector<1x1x2x8x128xf32>,
    %c0_46 = arith.constant 0 : index
    %c3 = arith.constant 3 : index
    %c0_47 = arith.constant 0 : index
    %c0_48 = arith.constant 0 : index
    %c0_49 = arith.constant 0 : index
    %69 = vector.load %arg4[%c0_46, %c3, %c0_47, %c0_48, %c0_49] : memref<1x5x2x8x128xf32, #tpu.memory_space<vmem>>, vector<1x1x2x8x128xf32>
    %70 = vector.shape_cast %69 : vector<1x1x2x8x128xf32> to vector<2x8x128xf32>
    %71 = arith.addf %70, %48 : vector<2x8x128xf32>
    %c0_50 = arith.constant 0 : index
    %c3_51 = arith.constant 3 : index
    %c0_52 = arith.constant 0 : index
    %c0_53 = arith.constant 0 : index
    %c0_54 = arith.constant 0 : index
    %72 = vector.load %arg4[%c0_50, %c3_51, %c0_52, %c0_53, %c0_54] : memref<1x5x2x8x128xf32, #tpu.memory_space<vmem>>, vector<1x1x2x8x128xf32>
    %73 = vector.shape_cast %72 : vector<1x1x2x8x128xf32> to vector<2x8x128xf32>
    %74 = vector.shape_cast %71 : vector<2x8x128xf32> to vector<1x1x2x8x128xf32>
    tpu.vector_store %arg4[%c0_50, %c3_51, %c0_52, %c0_53, %c0_54], %74 {strides = array<i32>} : memref<1x5x2x8x128xf32, #tpu.memory_space<vmem>>, vector<1x1x2x8x128xf32>,
    %c0_55 = arith.constant 0 : index
    %c4 = arith.constant 4 : index
    %c0_56 = arith.constant 0 : index
    %c0_57 = arith.constant 0 : index
    %c0_58 = arith.constant 0 : index
    %75 = vector.load %arg4[%c0_55, %c4, %c0_56, %c0_57, %c0_58] : memref<1x5x2x8x128xf32, #tpu.memory_space<vmem>>, vector<1x1x2x8x128xf32>
    %76 = vector.shape_cast %75 : vector<1x1x2x8x128xf32> to vector<2x8x128xf32>
    %77 = arith.addf %76, %50 : vector<2x8x128xf32>
    %c0_59 = arith.constant 0 : index
    %c4_60 = arith.constant 4 : index
    %c0_61 = arith.constant 0 : index
    %c0_62 = arith.constant 0 : index
    %c0_63 = arith.constant 0 : index
    %78 = vector.load %arg4[%c0_59, %c4_60, %c0_61, %c0_62, %c0_63] : memref<1x5x2x8x128xf32, #tpu.memory_space<vmem>>, vector<1x1x2x8x128xf32>
    %79 = vector.shape_cast %78 : vector<1x1x2x8x128xf32> to vector<2x8x128xf32>
    %80 = vector.shape_cast %77 : vector<2x8x128xf32> to vector<1x1x2x8x128xf32>
    tpu.vector_store %arg4[%c0_59, %c4_60, %c0_61, %c0_62, %c0_63], %80 {strides = array<i32>} : memref<1x5x2x8x128xf32, #tpu.memory_space<vmem>>, vector<1x1x2x8x128xf32>,
    return
  }
  func.func @transform_0(%arg0: i32, %arg1: i32) -> (i32, i32, i32, i32) {
    %c1_i32 = arith.constant 1 : i32
    %0 = arith.muli %arg0, %c1_i32 : i32
    %1 = arith.addi %0, %arg1 : i32
    %c0_i32 = arith.constant 0 : i32
    %2 = arith.minsi %1, %c0_i32 : i32
    %c0_i32_0 = arith.constant 0 : i32
    %c0_i32_1 = arith.constant 0 : i32
    %c0_i32_2 = arith.constant 0 : i32
    %c0_i32_3 = arith.constant 0 : i32
    return %c0_i32_0, %c0_i32_1, %2, %c0_i32_2 : i32, i32, i32, i32
  }
  func.func @transform_1(%arg0: i32, %arg1: i32) -> (i32, i32, i32, i32) {
    %c1_i32 = arith.constant 1 : i32
    %0 = arith.muli %arg0, %c1_i32 : i32
    %1 = arith.addi %0, %arg1 : i32
    %c0_i32 = arith.constant 0 : i32
    %2 = arith.minsi %1, %c0_i32 : i32
    %c0_i32_0 = arith.constant 0 : i32
    %c0_i32_1 = arith.constant 0 : i32
    %c0_i32_2 = arith.constant 0 : i32
    %c0_i32_3 = arith.constant 0 : i32
    return %c0_i32_0, %c0_i32_1, %2, %c0_i32_2 : i32, i32, i32, i32
  }
  func.func @transform_2(%arg0: i32, %arg1: i32) -> (i32, i32, i32, i32, i32) {
    %c0_i32 = arith.constant 0 : i32
    %c0_i32_0 = arith.constant 0 : i32
    %c0_i32_1 = arith.constant 0 : i32
    %c0_i32_2 = arith.constant 0 : i32
    %c0_i32_3 = arith.constant 0 : i32
    return %arg0, %c0_i32, %c0_i32_0, %c0_i32_1, %c0_i32_2 : i32, i32, i32, i32, i32
  }
}

</mosaic_0001>

<bundles_post_ra>
// kernel: jaccard_loss.1
= control target key start
LH: loop header
LB: loop body
LE: loop exit
PB: predicated region body
PF: predicated region fallthrough
CT: control target
= control target key end

     0   :  { %s450_s9 = smov 0   ;;  %s522_s0 = inlined_call_operand.vmem [shape: f32[2,2,2,128], index: 0, kind: input, shape index: {}]   ;;  %s523_s1 = inlined_call_operand.vmem [shape: f32[2,1,2,128], index: 1, kind: input, shape index: {}]   ;;  %s524_s2 = inlined_call_operand.vmem [shape: f32[1,5,2,8,128], index: 2, kind: output, shape index: {}]  }
   0x1 LB: > { %v36_v0 = vld [vmem:[%s522_s0] sm:$0x3]  ;;  %v38_v1 = vld [vmem:[%s522_s0 + $0x2] sm:$0x3]  ;;  %v40_v2 = vld [vmem:[%s522_s0 + $0x4] sm:$0x3]  ;;  %s452_s9 = sphi %s450_s9, %s30_s9  }
   0x2   : > { %37 = vst [vmem:[#allocation2] sm:$0x3] %v36_v0  ;;  %v42_v3 = vld [vmem:[%s522_s0 + $0x6] sm:$0x3]  ;;  %s30_s9 = sadd.s32 1, %s452_s9  }
   0x3   : > { %39 = vst [vmem:[#allocation2 + $0x8] sm:$0x3] %v38_v1  ;;  %p29_p0 = scmp.ge.s32.totalorder %s30_s9, 1 }
   0x4   : > { %41 = vst [vmem:[#allocation2 + $0x10] sm:$0x3] %v40_v2  ;;  %s454_s18 = smov (%p29_p0), 0  }
   0x5   : > { %43 = vst [vmem:[#allocation2 + $0x18] sm:$0x3] %v42_v3  ;;  %32 = sbr.rel (!%p29_p0) target bundleno = 1 (0x1), region = 124 }
   0xa LB: > { %v125_v4 = vld [vmem:[%s523_s1] sm:$0x3]  ;;  %v127_v5 = vld [vmem:[%s523_s1 + $0x2] sm:$0x3]  ;;  %s119_s18 = sadd.s32 1, %s456_s18   ;;  %s456_s18 = sphi %s454_s18, %s119_s18  }
   0xb   : > { %126 = vst [vmem:[#allocation3] sm:$0x3] %v125_v4  ;;  %p118_p1 = scmp.ge.s32.totalorder %s119_s18, 1 }
   0xc   : > { %128 = vst [vmem:[#allocation3 + $0x8] sm:$0x3] %v127_v5  ;;  %v193_v6 = vlaneseq (%p118_p1)  ;;  %v201_v13 = vld [vmem:[#allocation2] sm:$0xff] (%p118_p1)  ;;  %v205_v14 = vld [vmem:[#allocation2 + $0x8] sm:$0xff] (%p118_p1)  ;;  %v458_v15 = vmov (%p118_p1), 0.0   ;;  %v202_v17 = vld [vmem:[#allocation2 + $0x10] sm:$0xff] (%p118_p1) }
   0xd   :  { %121 = sbr.rel (!%p118_p1) target bundleno = 10 (0xa), region = 135  ;;  %v206_v18 = vld [vmem:[#allocation2 + $0x18] sm:$0xff] (%p118_p1) }
   0xe   :  { %v194_v7 = vshrl.u32 (%p118_p1), %v193_v6, 7  ;;  %v196_v8 = vand.u32 (%p118_p1), 127, %v193_v6 }
  0x10   :  { %v197_v10 = vmul.u32 (%p118_p1), 128, %v194_v7 }
  0x12   :  { %v199_v9 = vld [vmem:[#allocation3] sm:$0xff]  ;;  %v198_v12 = vadd.s32 %v197_v10, %v196_v8 }
  0x13   :  { %v200_v11 = vld [vmem:[#allocation3 + $0x8] sm:$0xff]  ;;  %vm207_vm0 = vcmp.gt.f32.partialorder %v199_v9, 0.0  ;;  %vm209_vm3 = vcmp.ge.f32.partialorder %v199_v9, 0.0 }
  0x14   :  { %vm208_vm1 = vcmp.gt.f32.partialorder %v200_v11, 0.0  ;;  %vm215_vm2 = vcmp.lt.s32.totalorder %v198_v12, 256  ;;  %vm210_vm5 = vcmp.ge.f32.partialorder %v200_v11, 0.0 }
  0x15   :  { %vm218_vm4 = vmand %vm215_vm2, %vm207_vm0 }
  0x16   :  { %v222_v16 = vsel %vm218_vm4, 1.0, %v458_v15  ;;  %vm219_vm6 = vmand %vm215_vm2, %vm208_vm1 }
  0x17   :  { %v223_v19 = vsel %vm219_vm6, 1.0, %v458_v15  ;;  %vm220_vm7 = vmand %vm215_vm2, %vm209_vm3  ;;  %246 = vst [vmem:[%s524_s2] sm:$0xff] %v222_v16 }
  0x18   :  { %v224_v20 = vsel %vm220_vm7, %v201_v13, 0.0  ;;  %vm221_vm8 = vmand %vm215_vm2, %vm210_vm5  ;;  %v226_v21 = vsel %vm220_vm7, %v205_v14, 0.0  ;;  %247 = vst [vmem:[%s524_s2 + $0x8] sm:$0xff] %v223_v19 }
  0x19   :  { %v225_v22 = vsel %vm221_vm8, %v202_v17, 0.0  ;;  %v227_v23 = vsel %vm221_vm8, %v206_v18, 0.0  ;;  %v234_v24 = vmul.f32 %v224_v20, %v222_v16  ;;  %339 = vst [vmem:[%s524_s2 + $0x10] sm:$0xff] %v224_v20  ;;  %v238_v26 = vmul.f32 %v226_v21, %v222_v16 }
  0x1a   :  { %v235_v25 = vmul.f32 %v225_v22, %v223_v19  ;;  %v239_v27 = vmul.f32 %v227_v23, %v223_v19  ;;  %340 = vst [vmem:[%s524_s2 + $0x18] sm:$0xff] %v225_v22 }
  0x1b   :  { %343 = vst [vmem:[%s524_s2 + $0x20] sm:$0xff] %v226_v21 }
  0x1c   :  { %344 = vst [vmem:[%s524_s2 + $0x28] sm:$0xff] %v227_v23 }
  0x1d   :  { %347 = vst [vmem:[%s524_s2 + $0x30] sm:$0xff] %v234_v24 }
  0x1e   :  { %348 = vst [vmem:[%s524_s2 + $0x38] sm:$0xff] %v235_v25 }
  0x1f   :  { %351 = vst [vmem:[%s524_s2 + $0x40] sm:$0xff] %v238_v26 }
  0x20   :  { %352 = vst [vmem:[%s524_s2 + $0x48] sm:$0xff] %v239_v27 }

</bundles_post_ra>
